<compile_context>
chip_gen: v7x
topology: tpu7x:2x2x1
jax: 0.10.0
libtpu: 0.0.40
codegen_flags: <defaults>
</compile_context>

<pallas_src>
import jax
import jax.numpy as jnp
from jax import lax
from jax.experimental import pallas as pl
from jax.experimental.pallas import tpu as pltpu


_NEG_BIG = -1e30  # effectively -inf for padded vocab columns, avoids inf math


def _round_up(x: int, m: int) -> int:
    return ((x + m - 1) // m) * m


def _device_vmem_budget() -> int:
    """Usable VMEM per TensorCore (with headroom for Mosaic internals)."""
    try:
        cap = int(pltpu.get_tpu_info().vmem_capacity_bytes)
    except Exception:
        cap = 64 * 1024 * 1024  # conservative (v7x-sized) fallback
    return max(int(cap * 0.85), 32 * 1024 * 1024)


def _pass1_vmem_bytes(tm: int, tn: int, Dp: int, Vp: int) -> int:
    """VMEM needed by the GEMM+lse pass (double-buffered blocks + temps)."""
    return (
        2 * tm * Dp * 2        # x tile (bf16), double-buffered
        + 2 * Dp * tn * 2      # weight tile (bf16), double-buffered
        + 2 * Vp * 4           # resident bias (counted x2 for safety)
        + 2 * tm * tn * 4      # streamed f32 logits output, double-buffered
        + 2 * tm * 128 * 4     # lse output block (padded to one lane tile)
        + 2 * tm * 128 * 4     # m / l scratch
        + 3 * tm * tn * 4      # in-kernel f32 temporaries (logits, exp, slack)
    )


# --------------------------------------------------------------------------
# Pass 1: logits tile GEMM + online log-sum-exp.
# --------------------------------------------------------------------------
def _gemm_lse_kernel(x_ref, w_ref, b_ref, logits_ref, lse_ref, m_sc, l_sc):
    """Grid: (M_tiles, V_tiles); vocab axis innermost ("arbitrary").

    x_ref:      (tm, Dp) bf16  -- same block for every vocab step
    w_ref:      (Dp, tn) bf16  -- pre-transposed weight tile
    b_ref:      (1,  Vp) f32   -- whole bias, resident across the grid
    logits_ref: (tm, tn) f32   -- streamed unnormalized logits
    lse_ref:    (tm, 1)  f32   -- per-row log-sum-exp, resident across vocab
    m_sc, l_sc: (tm, 1)  f32   -- running max / running sum of exp
    """
    j = pl.program_id(1)
    nj = pl.num_programs(1)
    tn = logits_ref.shape[1]

    @pl.when(j == 0)
    def _():
        m_sc[...] = jnp.full(m_sc.shape, -jnp.inf, m_sc.dtype)
        l_sc[...] = jnp.zeros(l_sc.shape, l_sc.dtype)

    col = pl.multiple_of(j * tn, tn)
    logits = lax.dot_general(
        x_ref[...],
        w_ref[...],
        dimension_numbers=(((1,), (0,)), ((), ())),
        preferred_element_type=jnp.float32,
    ) + b_ref[:, pl.ds(col, tn)]

    # Stream this vocab tile's unnormalized logits straight out (f32).
    logits_ref[...] = logits

    # Online max / log-sum-exp update (exact).
    m_prev = m_sc[...]
    m_new = jnp.maximum(m_prev, jnp.max(logits, axis=-1, keepdims=True))
    l_sc[...] = l_sc[...] * jnp.exp(m_prev - m_new) + jnp.sum(
        jnp.exp(logits - m_new), axis=-1, keepdims=True
    )
    m_sc[...] = m_new

    @pl.when(j == nj - 1)
    def _():
        lse_ref[...] = m_sc[...] + jnp.log(l_sc[...])


# --------------------------------------------------------------------------
# Pass 2: streamed epilogue -- subtract lse (f32) and cast to out_dtype.
# --------------------------------------------------------------------------
def _subtract_lse_kernel(logits_ref, lse_ref, o_ref):
    o_ref[...] = (logits_ref[...] - lse_ref[...]).astype(o_ref.dtype)


# --------------------------------------------------------------------------
# One-time weight preparation (per checkpoint, NOT per forward call).
# --------------------------------------------------------------------------
def prepare_generator_params(weight, bias, *, tn=512):
    """weight: [vocab, d_model] (PyTorch nn.Linear layout); bias: [vocab].

    Pads, casts to bf16 and transposes the weight to [Dp, Vp] once, and bakes
    the -1e30 sentinel into padded bias columns.
    """
    V, D = weight.shape
    Dp = _round_up(D, 128)
    tn = _round_up(min(tn, _round_up(V, 128)), 128)
    Vp = _round_up(_round_up(V, 128), tn)

    w_pad = jnp.pad(weight.astype(jnp.bfloat16), ((0, Vp - V), (0, Dp - D)))
    wT = jnp.transpose(w_pad)  # (Dp, Vp) bf16, ready for a plain contraction
    b_pad = jnp.full((1, Vp), _NEG_BIG, jnp.float32).at[0, :V].set(
        bias.astype(jnp.float32)
    )
    return {"wT": wT, "b": b_pad, "V": V, "D": D, "Dp": Dp, "Vp": Vp, "tn": tn}


# --------------------------------------------------------------------------
# Forward: log_softmax(x @ W.T + b, axis=-1)
# --------------------------------------------------------------------------
def generator_forward(x, params, *, tm=512, out_dtype=jnp.float32):
    """x: [..., d_model]; params: output of prepare_generator_params."""
    wT, b_pad = params["wT"], params["b"]
    V, D, Dp, Vp, tn = (
        params["V"], params["D"], params["Dp"], params["Vp"], params["tn"]
    )
    assert x.shape[-1] == D, "d_model mismatch between x and prepared weight"

    lead = x.shape[:-1]
    M = 1
    for s in lead:
        M *= s

    # ---- tile geometry, gated on the real per-core VMEM budget -------------
    Mp8 = _round_up(max(M, 1), 8)
    tm = _round_up(max(8, min(tm, Mp8)), 8)

    budget = _device_vmem_budget()
    while _pass1_vmem_bytes(tm, tn, Dp, Vp) > budget:
        if tm > 64:
            tm = _round_up(max(8, tm // 2), 8)
        elif tn > 128:
            tn = max(128, tn // 2)      # still divides Vp (halving a 128-mult)
        elif tm > 8:
            tm = _round_up(max(8, tm // 2), 8)
        else:
            break

    Mp = _round_up(max(M, 1), tm)
    n_row_tiles = Mp // tm
    n_col_tiles = Vp // tn
    out_itemsize = jnp.dtype(out_dtype).itemsize

    vmem_needed = _pass1_vmem_bytes(tm, tn, Dp, Vp)
    vmem_limit = int(min(budget, max(vmem_needed + (4 << 20), 32 << 20)))

    # ---- operand prep (only x is touched per call) --------------------------
    x2d = x.reshape(M, D)
    x_pad = jnp.pad(x2d, ((0, Mp - M), (0, Dp - D))).astype(jnp.bfloat16)

    # ---- pass 1: GEMM + online lse ------------------------------------------
    cost1 = pl.CostEstimate(
        flops=2 * Mp * Dp * Vp,
        transcendentals=Mp * Vp,
        bytes_accessed=(
            Mp * Dp * 2                      # x (bf16)
            + n_row_tiles * Vp * Dp * 2      # weight re-streamed per row tile
            + Vp * 4                         # bias
            + Mp * Vp * 4                    # streamed f32 logits write
            + Mp * 4                         # lse write
        ),
    )

    logits_pad, lse_pad = pl.pallas_call(
        _gemm_lse_kernel,
        out_shape=(
            jax.ShapeDtypeStruct((Mp, Vp), jnp.float32),
            jax.ShapeDtypeStruct((Mp, 1), jnp.float32),
        ),
        grid_spec=pltpu.PrefetchScalarGridSpec(
            num_scalar_prefetch=0,
            grid=(n_row_tiles, n_col_tiles),
            in_specs=[
                pl.BlockSpec((tm, Dp), lambda i, j: (i, 0)),   # x rows
                pl.BlockSpec((Dp, tn), lambda i, j: (0, j)),   # weight [Dp, Vp] tile
                pl.BlockSpec((1, Vp), lambda i, j: (0, 0)),    # bias, resident
            ],
            out_specs=[
                pl.BlockSpec((tm, tn), lambda i, j: (i, j)),   # streamed logits
                pl.BlockSpec((tm, 1), lambda i, j: (i, 0)),    # lse, resident over j
            ],
            scratch_shapes=[
                pltpu.VMEM((tm, 1), jnp.float32),  # running max
                pltpu.VMEM((tm, 1), jnp.float32),  # running sum-exp
            ],
        ),
        compiler_params=pltpu.CompilerParams(
            dimension_semantics=("parallel", "arbitrary"),
            vmem_limit_bytes=vmem_limit,
        ),
        cost_estimate=cost1,
    )(x_pad, wT, b_pad)

    # ---- pass 2: subtract lse in f32, cast to out_dtype ---------------------
    cost2 = pl.CostEstimate(
        flops=Mp * Vp,
        transcendentals=0,
        bytes_accessed=Mp * Vp * 4 + Mp * 4 + Mp * Vp * out_itemsize,
    )

    out_pad = pl.pallas_call(
        _subtract_lse_kernel,
        out_shape=jax.ShapeDtypeStruct((Mp, Vp), out_dtype),
        grid_spec=pltpu.PrefetchScalarGridSpec(
            num_scalar_prefetch=0,
            grid=(n_row_tiles, n_col_tiles),
            in_specs=[
                pl.BlockSpec((tm, tn), lambda i, j: (i, j)),
                pl.BlockSpec((tm, 1), lambda i, j: (i, 0)),
            ],
            out_specs=pl.BlockSpec((tm, tn), lambda i, j: (i, j)),
        ),
        compiler_params=pltpu.CompilerParams(
            dimension_semantics=("parallel", "parallel"),
            vmem_limit_bytes=vmem_limit,
        ),
        cost_estimate=cost2,
    )(logits_pad, lse_pad)

    return out_pad[:M, :V].reshape(*lead, V)


def generator_forward_from_linear(x, weight, bias, *, tm=512, tn=512,
                                  out_dtype=jnp.float32):
    """Convenience wrapper: prepares the weight on every call (prefer caching
    prepare_generator_params once per checkpoint)."""
    params = prepare_generator_params(weight, bias, tn=tn)
    return generator_forward(x, params, tm=tm, out_dtype=out_dtype)


if __name__ == "__main__":
    # Small deterministic example consistent with the module's forward:
    # x: [batch=2, seq=8, d_model=32], vocab_size=200 (non-multiple of 128 to
    # exercise the padding + masked-column path).
    batch, seq, d_model, vocab = 2, 8, 32, 200

    key = jax.random.PRNGKey(0)
    kx, kw, kb = jax.random.split(key, 3)
    x = jax.random.normal(kx, (batch, seq, d_model), dtype=jnp.float32)
    # nn.Linear(d_model, vocab): weight [vocab, d_model], bias [vocab]
    weight = jax.random.normal(kw, (vocab, d_model), dtype=jnp.float32) * 0.05
    bias = jax.random.normal(kb, (vocab,), dtype=jnp.float32) * 0.05

    # Weight prep happens once (per checkpoint), not per forward call.
    # Small tiles here so the test covers the multi-tile online log-sum-exp
    # path (grid = (2, 2)); production defaults are tm=512, tn=512.
    params = prepare_generator_params(weight, bias, tn=128)
    out = generator_forward(x, params, tm=8, out_dtype=jnp.float32)
    jax.block_until_ready(out)

    ref = jax.nn.log_softmax(x @ weight.T + bias, axis=-1)
    assert out.shape == (batch, seq, vocab)
    max_err = float(jnp.max(jnp.abs(out - ref)))
    assert max_err < 2e-2, f"max abs err {max_err}"  # bf16 operand quantization

    print("KERNEL_OK")
</pallas_src>

<mosaic_0001>
module attributes {stable_mosaic.version = 11 : i64} {
  func.func @_gemm_lse_kernel(%arg0: i32, %arg1: i32, %arg2: memref<8x128xbf16, #tpu.memory_space<vmem>>, %arg3: memref<128x128xbf16, #tpu.memory_space<vmem>>, %arg4: memref<1x256xf32, #tpu.memory_space<vmem>>, %arg5: memref<8x128xf32, #tpu.memory_space<vmem>>, %arg6: memref<8x1xf32, #tpu.memory_space<vmem>>, %arg7: memref<8x1xf32, #tpu.memory_space<vmem>>, %arg8: memref<8x1xf32, #tpu.memory_space<vmem>>) attributes {dimension_semantics = [#tpu.dimension_semantics<parallel>, #tpu.dimension_semantics<arbitrary>], iteration_bounds = array<i64: 2, 2>, scalar_prefetch = 0 : i64, scratch_operands = 2 : i64, tpu.core_type = #tpu.core_type<tc>, window_params = [{transform_indices = @transform_0, window_bounds = array<i64: 8, 128>}, {transform_indices = @transform_1, window_bounds = array<i64: 128, 128>}, {pipeline_mode = #tpu.pipeline_mode<synchronous>, transform_indices = @transform_2, window_bounds = array<i64: 1, 256>}, {transform_indices = @transform_3, window_bounds = array<i64: 8, 128>}, {transform_indices = @transform_4, window_bounds = array<i64: 8, 1>}]} {
    %c0_i32 = arith.constant 0 : i32
    %0 = arith.cmpi eq, %arg1, %c0_i32 : i32
    %1 = arith.extui %0 : i1 to i32
    %c0_i32_0 = arith.constant 0 : i32
    %2 = arith.cmpi ne, %1, %c0_i32_0 : i32
    scf.if %2 {
      %cst_18 = arith.constant 0xFF800000 : f32
      %32 = vector.broadcast %cst_18 : f32 to vector<8x1xf32>
      %c0_19 = arith.constant 0 : index
      %c0_20 = arith.constant 0 : index
      %33 = vector.load %arg7[%c0_19, %c0_20] : memref<8x1xf32, #tpu.memory_space<vmem>>, vector<8x1xf32>
      tpu.vector_store %arg7[%c0_19, %c0_20], %32 {strides = array<i32>} : memref<8x1xf32, #tpu.memory_space<vmem>>, vector<8x1xf32>,
      %cst_21 = arith.constant 0.000000e+00 : f32
      %34 = vector.broadcast %cst_21 : f32 to vector<8x1xf32>
      %c0_22 = arith.constant 0 : index
      %c0_23 = arith.constant 0 : index
      %35 = vector.load %arg8[%c0_22, %c0_23] : memref<8x1xf32, #tpu.memory_space<vmem>>, vector<8x1xf32>
      tpu.vector_store %arg8[%c0_22, %c0_23], %34 {strides = array<i32>} : memref<8x1xf32, #tpu.memory_space<vmem>>, vector<8x1xf32>,
    } else {
    }
    %c128_i32 = arith.constant 128 : i32
    %3 = arith.muli %arg1, %c128_i32 : i32
    %4 = tpu.assume_multiple %3, 128 : i32
    %c0 = arith.constant 0 : index
    %c0_1 = arith.constant 0 : index
    %5 = vector.load %arg2[%c0, %c0_1] : memref<8x128xbf16, #tpu.memory_space<vmem>>, vector<8x128xbf16>
    %c0_2 = arith.constant 0 : index
    %c0_3 = arith.constant 0 : index
    %6 = vector.load %arg3[%c0_2, %c0_3] : memref<128x128xbf16, #tpu.memory_space<vmem>>, vector<128x128xbf16>
    %cst = arith.constant dense<0.000000e+00> : vector<8x128xf32>
    %7 = tpu.matmul %5, %6, %cst {dimension_numbers = #tpu.dot_dimension_numbers<[1], [0], [0], [1], [0, 0, 1, 1], [], []>} : vector<8x128xbf16>, vector<128x128xbf16>, vector<8x128xf32> -> vector<8x128xf32>
    %c0_4 = arith.constant 0 : index
    %8 = arith.index_cast %4 : i32 to index
    %9 = vector.load %arg4[%c0_4, %8] : memref<1x256xf32, #tpu.memory_space<vmem>>, vector<1x128xf32>
    %10 = vector.broadcast %9 : vector<1x128xf32> to vector<8x128xf32>
    %11 = arith.addf %7, %10 : vector<8x128xf32>
    %c0_5 = arith.constant 0 : index
    %c0_6 = arith.constant 0 : index
    %12 = vector.load %arg5[%c0_5, %c0_6] : memref<8x128xf32, #tpu.memory_space<vmem>>, vector<8x128xf32>
    tpu.vector_store %arg5[%c0_5, %c0_6], %11 {strides = array<i32>} : memref<8x128xf32, #tpu.memory_space<vmem>>, vector<8x128xf32>,
    %c0_7 = arith.constant 0 : index
    %c0_8 = arith.constant 0 : index
    %13 = vector.load %arg7[%c0_7, %c0_8] : memref<8x1xf32, #tpu.memory_space<vmem>>, vector<8x1xf32>
    %cst_9 = arith.constant dense<0xFF800000> : vector<8xf32>
    %14 = vector.multi_reduction <maximumf>, %11, %cst_9 [1] : vector<8x128xf32> to vector<8xf32>
    %15 = vector.shape_cast %14 : vector<8xf32> to vector<8x1xf32>
    %16 = arith.maximumf %13, %15 : vector<8x1xf32>
    %c0_10 = arith.constant 0 : index
    %c0_11 = arith.constant 0 : index
    %17 = vector.load %arg8[%c0_10, %c0_11] : memref<8x1xf32, #tpu.memory_space<vmem>>, vector<8x1xf32>
    %18 = arith.subf %13, %16 : vector<8x1xf32>
    %19 = math.exp %18 : vector<8x1xf32>
    %20 = arith.mulf %17, %19 : vector<8x1xf32>
    %21 = vector.broadcast %16 : vector<8x1xf32> to vector<8x128xf32>
    %22 = arith.subf %11, %21 : vector<8x128xf32>
    %23 = math.exp %22 : vector<8x128xf32>
    %cst_12 = arith.constant dense<0.000000e+00> : vector<8xf32>
    %24 = vector.multi_reduction <add>, %23, %cst_12 [1] : vector<8x128xf32> to vector<8xf32>
    %25 = vector.shape_cast %24 : vector<8xf32> to vector<8x1xf32>
    %26 = arith.addf %20, %25 : vector<8x1xf32>
    %c0_13 = arith.constant 0 : index
    %c0_14 = arith.constant 0 : index
    %27 = vector.load %arg8[%c0_13, %c0_14] : memref<8x1xf32, #tpu.memory_space<vmem>>, vector<8x1xf32>
    tpu.vector_store %arg8[%c0_13, %c0_14], %26 {strides = array<i32>} : memref<8x1xf32, #tpu.memory_space<vmem>>, vector<8x1xf32>,
    %c0_15 = arith.constant 0 : index
    %c0_16 = arith.constant 0 : index
    %28 = vector.load %arg7[%c0_15, %c0_16] : memref<8x1xf32, #tpu.memory_space<vmem>>, vector<8x1xf32>
    tpu.vector_store %arg7[%c0_15, %c0_16], %16 {strides = array<i32>} : memref<8x1xf32, #tpu.memory_space<vmem>>, vector<8x1xf32>,
    %c1_i32 = arith.constant 1 : i32
    %29 = arith.cmpi eq, %arg1, %c1_i32 : i32
    %30 = arith.extui %29 : i1 to i32
    %c0_i32_17 = arith.constant 0 : i32
    %31 = arith.cmpi ne, %30, %c0_i32_17 : i32
    scf.if %31 {
      %c0_18 = arith.constant 0 : index
      %c0_19 = arith.constant 0 : index
      %32 = vector.load %arg7[%c0_18, %c0_19] : memref<8x1xf32, #tpu.memory_space<vmem>>, vector<8x1xf32>
      %c0_20 = arith.constant 0 : index
      %c0_21 = arith.constant 0 : index
      %33 = vector.load %arg8[%c0_20, %c0_21] : memref<8x1xf32, #tpu.memory_space<vmem>>, vector<8x1xf32>
      %34 = math.log %33 : vector<8x1xf32>
      %35 = arith.addf %32, %34 : vector<8x1xf32>
      %c0_22 = arith.constant 0 : index
      %c0_23 = arith.constant 0 : index
      %36 = vector.load %arg6[%c0_22, %c0_23] : memref<8x1xf32, #tpu.memory_space<vmem>>, vector<8x1xf32>
      tpu.vector_store %arg6[%c0_22, %c0_23], %35 {strides = array<i32>} : memref<8x1xf32, #tpu.memory_space<vmem>>, vector<8x1xf32>,
    } else {
    }
    return
  }
  func.func @transform_0(%arg0: i32, %arg1: i32) -> (i32, i32) {
    %c0_i32 = arith.constant 0 : i32
    %c0_i32_0 = arith.constant 0 : i32
    return %arg0, %c0_i32 : i32, i32
  }
  func.func @transform_1(%arg0: i32, %arg1: i32) -> (i32, i32) {
    %c0_i32 = arith.constant 0 : i32
    %c0_i32_0 = arith.constant 0 : i32
    return %c0_i32, %arg1 : i32, i32
  }
  func.func @transform_2(%arg0: i32, %arg1: i32) -> (i32, i32) {
    %c0_i32 = arith.constant 0 : i32
    %c0_i32_0 = arith.constant 0 : i32
    %c0_i32_1 = arith.constant 0 : i32
    return %c0_i32, %c0_i32_0 : i32, i32
  }
  func.func @transform_3(%arg0: i32, %arg1: i32) -> (i32, i32) {
    %c0_i32 = arith.constant 0 : i32
    return %arg0, %arg1 : i32, i32
  }
  func.func @transform_4(%arg0: i32, %arg1: i32) -> (i32, i32) {
    %c0_i32 = arith.constant 0 : i32
    %c0_i32_0 = arith.constant 0 : i32
    return %arg0, %c0_i32 : i32, i32
  }
}

</mosaic_0001>

<bundles_post_ra>
// kernel: tpu_custom_call.1
= control target key start
LH: loop header
LB: loop body
LE: loop exit
PB: predicated region body
PF: predicated region fallthrough
CT: control target
= control target key end

     0   :  { %s1422_s0 = inlined_call_operand.hbm [shape: bf16[16,128], index: 0, kind: input, shape index: {}]   ;;  %s1423_s1 = inlined_call_operand.hbm [shape: bf16[128,256], index: 1, kind: input, shape index: {}]   ;;  %s1424_s2 = inlined_call_operand.vmem [shape: f32[1,256], index: 2, kind: input, shape index: {}]   ;;  %s1425_s3 = inlined_call_operand.hbm [shape: f32[16,256], index: 3, kind: output, shape index: {0}]   ;;  %s1426_s4 = inlined_call_operand.vmem [shape: f32[16,1], index: 4, kind: output, shape index: {1}]  }
   0x1   :  { %1436 = sst [smem:[#allocation21_spill]] %s1422_s0 }
   0x2   :  { %10 = vsyncpa [#allocation5], 0 }
   0x3   :  { %12 = vsyncpa [#allocation5 + $0x1], 0 }
   0x4   :  { %13 = vsyncpa [#allocation8], 0 }
   0x5   :  { %15 = vsyncpa [#allocation8 + $0x1], 0 }
   0x6   :  { %16 = vsyncpa [#allocation6], 0 }
   0x7   :  { %18 = vsyncpa [#allocation6 + $0x1], 0  ;;  %s1050_s15 = smov 0   ;;  %s1052_s16 = smov 0  }
   0x8   :  { %s1054_s17 = smov 0   ;;  %s1056_s18 = smov 0  }
   0x9   :  { %s1058_s19 = smov 0   ;;  %s1060_s20 = smov 0  }
   0xa   :  { %s1062_s21 = smov 0   ;;  %s1064_s22 = smov 0  }
   0xb   :  { %s1066_s23 = smov 0   ;;  %s1068_s24 = smov 0  }
   0xc   :  { %s1070_s25 = smov 0   ;;  %s1072_s26 = smov 0  }
   0xd   :  { %s1074_s27 = smov 0   ;;  %s1076_s28 = smov 0  }
   0xe LB: > { %1437 = sst [smem:[#allocation13_spill]] %s960_s15  ;;  %s1427_s29 = sadd.s32 4294967295, %s1012_s28   ;;  %s1012_s28 = sphi %s1076_s28, %s24_s28   ;;  %s1008_s27 = sphi %s1074_s27, %s1472_s27   ;;  %s1004_s26 = sphi %s1072_s26, %s1482_s26   ;;  %s1000_s25 = sphi %s1070_s25, %s1470_s25   ;;  %s996_s24 = sphi %s1068_s24, %s1469_s24   ;;  %s992_s23 = sphi %s1066_s23, %s1481_s23   ;;  %s988_s22 = sphi %s1064_s22, %s1480_s22   ;;  %s984_s21 = sphi %s1062_s21, %s1479_s21   ;;  %s980_s20 = sphi %s1060_s20, %s1478_s20   ;;  %s976_s19 = sphi %s1058_s19, %s1477_s19   ;;  %s972_s18 = sphi %s1056_s18, %s1476_s18   ;;  %s968_s17 = sphi %s1054_s17, %s1475_s17   ;;  %s964_s16 = sphi %s1052_s16, %s1474_s16   ;;  %s960_s15 = sphi %s1050_s15, %s1473_s15  }
   0xf   : > { %1438 = sst [smem:[#allocation14_spill]] %s1004_s26  ;;  %s33_s5 = sadd.s32 1, %s1004_s26 }
  0x10   : > { %1439 = sst [smem:[#allocation15_spill]] %s1008_s27  ;;  %s36_s6 = sadd.s32 1, %s1008_s27 }
  0x11   : > { %p34_p0 = scmp.ge.s32.totalorder %s33_s5, 2  ;;  %s43_s7 = sadd.s32 1, %s992_s23 }
  0x12   : > { %p50_p1 = scmp.ne.s32.totalorder %s992_s23, %s988_s22  ;;  %p51_p2 = scmp.eq.s32.totalorder %s1012_s28, 0 }
  0x13   : > { %s1484_s5 = smov (%p34_p0, %s33_s5), 0  ;;  %s1486_s6 = smov (!%p34_p0, %s36_s6), %s1008_s27 }
  0x14   : > { %1440 = sst [smem:[#allocation16_spill]] %s1484_s5  ;;  %p1131_p3 = por %p51_p2, %p50_p1 }
  0x15   : > { %p56_p4 = scmp.ne.s32.totalorder %s988_s22, %s984_s21  ;;  %p38_p5 = scmp.ge.s32.totalorder %s1486_s6, 2 }
  0x16   : > { %p1138_p6 = scmp.eq.s32.totalorder %s1427_s29, 0  ;;  %s66_s10 = ssub.s32 %s1004_s26, %s1484_s5 }
  0x17   : > { %s69_s11 = sadd.s32 1, %s980_s20  ;;  %s1488_s6 = smov (%p38_p5, %s1486_s6), 0 }
  0x18   : > { %1443 = sst [smem:[#allocation17_spill]] %s1488_s6  ;;  %p1149_p7 = por %p1138_p6, %p56_p4 }
  0x19   : > { %p67_p8 = scmp.eq.s32.totalorder %s66_s10, 0  ;;  %s40_s13 = ssub.s32 %s1008_s27, %s1488_s6 }
  0x1a   : > { %s1444_s12 = scalar_select %p1149_p7, 1, 0 }
  0x1b   : > { %p76_p9 = scmp.ne.s32.totalorder %s980_s20, %s976_s19  ;;  %p41_p10 = scmp.eq.s32.totalorder %s40_s13, 0 }
  0x1c   : > { %p82_p11 = scmp.ne.s32.totalorder %s976_s19, %s972_s18  ;;  %s115_s6 = sor.u32 %s66_s10, %s40_s13 }
  0x1d   : > { %s1160_s14 = scalar_select %p67_p8, %s980_s20, %s69_s11  }
  0x1e   : > { %s1163_s21 = scalar_select %p41_p10, %s992_s23, %s43_s7  }
  0x1f   : > { %1445 = sst [smem:[#allocation18_spill]] %s1160_s14  ;;  %p1167_p12 = por %p76_p9, %p51_p2 }
  0x20   : > { %1446 = sst [smem:[#allocation19_spill]] %s1163_s21  ;;  %p1173_p13 = por %p82_p11, %p1138_p6 }
  0x21   : > { %s118_s5 = sadd.s32 1, %s968_s17  ;;  %p116_p0 = scmp.eq.s32.totalorder %s115_s6, 0 }
  0x22   : > { %s1448_s29 = scalar_select %p1173_p13, 1, 0 }
  0x23   : > { %p128_p1 = scmp.ne.s32.totalorder %s968_s17, %s964_s16  ;;  %s1449_s18 = sadd.s32 4294967295, %s1012_s28  }
  0x24   : > { %p129_p4 = scmp.eq.s32.totalorder %s1449_s18, 3  ;;  %p134_p5 = scmp.ne.s32.totalorder %s964_s16, %s960_s15 }
  0x25   : > { %s1185_s7 = scalar_select %p116_p0, %s968_s17, %s118_s5  }
  0x26   : > { %p1187_p2 = por %p129_p4, %p128_p1  ;;  %s1452_s9 = sadd.s32 4294967294, %s1012_s28  }
  0x27   : > { %1450 = sst [smem:[#allocation20_spill]] %s1185_s7  ;;  %p135_p6 = scmp.eq.s32.totalorder %s1452_s9, 3 }
  0x28   : > { %s1451_s11 = scalar_select %p1187_p2, 1, 0 }
  0x29   : > { %p665_p8 = scmp.lt.s32.totalorder %s1012_s28, 4  ;;  %p1194_p9 = por %p135_p6, %p134_p5 }
  0x2a   : > { %s184_s6 = sand.u32 1, %s992_s23   ;;  %s594_s21 = sshll.u32 %s1008_s27, 6 }
  0x2b   : > { %s1453_s10 = scalar_select %p1194_p9, 1, 0 }
  0x2c   : > { %s593_s13 = sshll.u32 %s184_s6, 2  ;;  %s1454_s0 = sld [smem:[#allocation21_spill]] }
  0x2d   : > { %s188_s5 = scalar_lea.vmem [#allocation4], %s593_s13  ;;  %p1209_p10 = pnand %p665_p8, %p1131_p3 }
  0x2e   : > { %s195_s7 = sshll.u32 %s188_s5, 4  ;;  %p1215_p11 = pnand %p665_p8, %p1167_p12  ;;  %s1205_s7 = int_to_ptr.vmem [resolvable:$true] %s195_s7 }
  0x2f   : > { %p804_p5 = pneg %p1209_p10 }
  0x32   : > { %s1203_s15 = scalar_lea.hbm %s1454_s0, %s594_s21  ;;  %s185_s21 = scalar_lea.sflag [#allocation5], %s184_s6 }
  0x33   : > { %s802_s13 = scalar_lea.hbm %s1203_s15, 64  ;;  %s807_s30 = scalar_lea.hbm %s1454_s0, 128 }
  0x34   : > { %p803_p4 = scmp.ne.s32.totalorder %s1203_s15, %s802_s13  ;;  %p808_p12 = scmp.lt.u32.totalorder %s1203_s15, %s1454_s0 }
  0x35   : > { %p809_p8 = scmp.lt.u32.totalorder %s807_s30, %s802_s13  ;;  %p811_p1 = scmp.lt.u32.totalorder %s802_s13, %s1203_s15 }
  0x36   : > { %p805_p3 = pnand %p804_p5, %p803_p4 }
  0x37   : > { %p810_p0 = por %p809_p8, %p808_p12 }
  0x38   : > { %p806_p6 = pneg %p805_p3 }
  0x39   : > { %p812_p9 = por %p811_p1, %p810_p0 }
  0x3b   : > { %p813_p2 = pnand %p812_p9, %p806_p6 }
  0x3d   : > { %816 = shalt.err (!%p813_p2)
}
  0x3e   : > { %s817_s6 = scalar_lea.vmem %s1205_s7, 64  ;;  %s1014_s8 = smov [#allocation4]  }
  0x3f   : > { %p818_p4 = scmp.ne.s32.totalorder %s1205_s7, %s817_s6  ;;  %s822_s18 = sshll.u32 %s1014_s8, 4  ;;  %s823_s18 = int_to_ptr.vmem [resolvable:$false] %s822_s18 }
  0x40   : > { %s824_s27 = scalar_lea.vmem %s823_s18, 128  ;;  %p825_p7 = scmp.lt.s32.totalorder %s1205_s7, %s823_s18 }
  0x41   : > { %p820_p3 = pnand %p818_p4, %p804_p5  ;;  %p826_p12 = scmp.lt.s32.totalorder %s824_s27, %s817_s6 }
  0x43   : > { %p821_p13 = pneg %p820_p3  ;;  %p827_p8 = por %p826_p12, %p825_p7 }
  0x45   : > { %p828_p0 = pnand %p827_p8, %p821_p13 }
  0x47   : > { %831 = shalt.err (!%p828_p0)
}
  0x48   : > { %657 = dma.hbm_to_vmem [thread:$0]  (!%p1209_p10), %s1203_s15, 64, %s1205_s7, %s185_s21  }
  0x49   : > { %p1457_p2 = scmp.lt.s32.totalorder %s1012_s28, 5  ;;  %p1458_p9 = scmp.ge.s32.totalorder %s1012_s28, 1 }
  0x4a   : > { %s202_s30 = sand.u32 1, %s980_s20   ;;  %s596_s5 = sshll.u32 %s1004_s26, 6 }
  0x4b   : > { %p1250_p1 = pnand %p1458_p9, %p1457_p2  ;;  %s595_s6 = sshll.u32 %s202_s30, 6 }
  0x4c   : > { %s1259_s18 = scalar_lea.hbm %s1423_s1, %s596_s5  ;;  %s206_s27 = scalar_lea.vmem [#allocation7], %s595_s6 }
  0x4d   : > { %s212_s15 = sshll.u32 %s206_s27, 4  ;;  %s1263_s7 = scalar_lea.sflag [#allocation8], %s202_s30  ;;  %s1261_s15 = int_to_ptr.vmem [resolvable:$true] %s212_s15 }
  0x4e   : > { %s832_s21 = scalar_lea.hbm %s1259_s18, 1024  ;;  %p834_p13 = pneg %p1215_p11 }
  0x4f   : > { %p833_p7 = scmp.ne.s32.totalorder %s1259_s18, %s832_s21  ;;  %s837_s9 = scalar_lea.hbm %s1423_s1, 2048 }
  0x50   : > { %p838_p6 = scmp.lt.u32.totalorder %s1259_s18, %s1423_s1  ;;  %p839_p4 = scmp.lt.u32.totalorder %s837_s9, %s832_s21 }
  0x51   : > { %p835_p10 = pnand %p834_p13, %p833_p7  ;;  %p841_p12 = scmp.lt.u32.totalorder %s832_s21, %s1259_s18 }
  0x52   : > { %p840_p3 = por %p839_p4, %p838_p6 }
  0x53   : > { %p836_p5 = pneg %p835_p10 }
  0x54   : > { %p842_p8 = por %p841_p12, %p840_p3 }
  0x56   : > { %p843_p0 = pnand %p842_p8, %p836_p5 }
  0x58   : > { %846 = shalt.err (!%p843_p0)
}
  0x59   : > { %s847_s30 = scalar_lea.vmem %s1261_s15, 1024  ;;  %s1015_s6 = smov [#allocation7]  }
  0x5a   : > { %p848_p2 = scmp.ne.s32.totalorder %s1261_s15, %s847_s30  ;;  %s852_s27 = sshll.u32 %s1015_s6, 4  ;;  %s853_s27 = int_to_ptr.vmem [resolvable:$false] %s852_s27 }
  0x5b   : > { %s854_s0 = scalar_lea.vmem %s853_s27, 2048  ;;  %p855_p10 = scmp.lt.s32.totalorder %s1261_s15, %s853_s27 }
  0x5c   : > { %p850_p9 = pnand %p848_p2, %p834_p13  ;;  %p856_p6 = scmp.lt.s32.totalorder %s854_s0, %s847_s30 }
  0x5e   : > { %p851_p7 = pneg %p850_p9  ;;  %p857_p4 = por %p856_p6, %p855_p10 }
  0x60   : > { %p858_p3 = pnand %p857_p4, %p851_p7 }
  0x62   : > { %861 = shalt.err (!%p858_p3)
}
  0x63   : > { %s1016_s26 = smov 128   ;;  %s1017_s21 = smov 64  }
  0x64   : > { %s1018_s5 = smov 4   ;;  %224 = sbr.rel (%p1250_p1) target bundleno = 850 (0x352), region = 32 }
  0x65   : > { %660 = dma.hbm_to_vmem [thread:$0]  (!%p1215_p11), %s1259_s18, 1024, %s1261_s15, %s1263_s7, %s1016_s26, %s1017_s21, %s1018_s5  }
  0x66   : > { %s226_s8 = sand.u32 (!%p1250_p1), 1, %s988_s22   ;;  %p1460_p13 = scmp.ne.s32.totalorder (!%p1250_p1), %s1444_s12, 0 }
  0x67   : > { %s1294_s9 = sshll.u32 (!%p1250_p1), %s226_s8, 2  ;;  %s227_s30 = scalar_lea.sflag (!%p1250_p1), [#allocation5], %s226_s8 }
  0x68   : > { %s230_s6 = scalar_lea.vmem (!%p1250_p1), [#allocation4], %s1294_s9 }
  0x6b   : > { %947 = dma.done.wait (%p1460_p13), %s227_s30, 64  }
  0x6c   : > { %949 = vsyncadd (%p1460_p13), %s227_s30, 4294967232  ;;  %s235_s14 = sand.u32 1, %s976_s19   ;;  %p1461_p11 = scmp.ne.s32.totalorder %s1448_s29, 0 }
  0x6d   : > { %s599_s18 = sshll.u32 %s235_s14, 6  ;;  %s236_s15 = scalar_lea.sflag [#allocation8], %s235_s14 }
  0x6e   : > { %s1302_s13 = scalar_lea.vmem [#allocation7], %s599_s18 }
  0x6f   : > { %951 = dma.done.wait (%p1461_p11), %s236_s15, 1024  }
  0x70   : > { %953 = vsyncadd (%p1461_p11), %s236_s15, 4294966272  ;;  %s264_s7 = sand.u32 1, %s964_s16   ;;  %p273_p1 = scmp.lt.s32.totalorder %s1000_s25, 1 }
  0x71   : > { %s1312_s12 = sshll.u32 %s264_s7, 3  ;;  %p602_p5 = scmp.ne.s32.totalorder %s996_s24, 0 }
  0x72   : > { %s274_s27 = scalar_select %p273_p1, %s1000_s25, 1 }
  0x73   : > { %s266_s8 = scalar_lea.vmem [#allocation9], %s1312_s12  ;;  %281 = sbr.rel (%p602_p5) target bundleno = 122 (0x7a), region = 44  ;;  %vm282_vm0 = vcmask (!%p602_p5), 7168   ;;  %v1019_v0 = vmov (!%p602_p5), -inf   ;;  %v1020_v1 = vmov (!%p602_p5), 0.0  }
  0x74   : > { %s601_s0 = sshll.u32 %s274_s27, 3  ;;  %283 = vst.msk [vmem:[#allocation2] sm:$0xff] (!%p602_p5), %vm282_vm0, %v1019_v0  ;;  %284 = vst.msk [vmem:[#allocation3] sm:$0xff] (!%p602_p5), %vm282_vm0, %v1020_v1 }
  0x75   : > { %s1318_s5 = scalar_lea.vmem %s1426_s4, %s601_s0 }
  0x7a PF: > { %v788_v2 = vld [vmem:[%s1302_s13] sm:$0xff]   ;;  %v1021_v3 = vmov 0.0   ;;  %v789_v4 = vld [vmem:[%s1302_s13 + $0x8] sm:$0xff]   ;;  %vm1022_vm1 = vmmov 0   ;;  %v790_v5 = vld [vmem:[%s1302_s13 + $0x10] sm:$0xff]   ;;  %s603_s29 = sshll.u32 %s996_s24, 7 }
  0x7b   : > { %628 = vmatprep.subr.bf16.mxu0 %v1021_v3  ;;  %644 = vmatprep.mubr.msk.bf16.mxu0 %vm1022_vm1, %v1021_v3  ;;  %v791_v6 = vld [vmem:[%s1302_s13 + $0x18] sm:$0xff]   ;;  %v792_v7 = vld [vmem:[%s1302_s13 + $0x20] sm:$0xff]   ;;  %v793_v8 = vld [vmem:[%s1302_s13 + $0x28] sm:$0xff]   ;;  %s303_s30 = sshra.s32 %s603_s29, 7  ;;  %v1023_v18 = vmov 0   ;;  %vm422_vm2 = vcmask 7168  }
  0x7c   : > { %629 = vmatpush3.bf16.msra.mxu0 %v788_v2  ;;  %v794_v9 = vld [vmem:[%s1302_s13 + $0x30] sm:$0xff]   ;;  %v795_v10 = vld [vmem:[%s1302_s13 + $0x38] sm:$0xff]   ;;  %s305_s15 = scalar_lea.vmem %s1424_s2, %s303_s30  ;;  %787 = vset.pattern.permute.xlu0 %v1023_v18  ;;  %v402_v19 = vld [vmem:[#allocation2] sm:$0xff]  ;;  %p613_p12 = scmp.ne.s32.totalorder %s996_s24, 1 }
  0x7d   : > { %630 = vmatprep.subr.bf16.mxu0 %v1021_v3  ;;  %v286_v11 = vld [vmem:[%s230_s6] sm:$0xf]  ;;  %v406_v29 = vld [vmem:[#allocation3] sm:$0xff] }
  0x7e   : > { %v604_v12 = vld [vmem:[%s305_s15] ss:$0 sm:$0xff] }
  0x80   : > { %631 = vmatpush3.bf16.msra.mxu0 %v789_v4 }
  0x81   : > { %632 = vmatprep.subr.bf16.mxu0 %v1021_v3 }
  0x84   : > { %633 = vmatpush3.bf16.msra.mxu0 %v790_v5 }
  0x85   : > { %634 = vmatprep.subr.bf16.mxu0 %v1021_v3 }
  0x88   : > { %635 = vmatpush3.bf16.msra.mxu0 %v791_v6 }
  0x89   : > { %636 = vmatprep.subr.bf16.mxu0 %v1021_v3 }
  0x8c   : > { %637 = vmatpush3.bf16.msra.mxu0 %v792_v7 }
  0x8d   : > { %638 = vmatprep.subr.bf16.mxu0 %v1021_v3 }
  0x90   : > { %639 = vmatpush3.bf16.msra.mxu0 %v793_v8 }
  0x91   : > { %640 = vmatprep.subr.bf16.mxu0 %v1021_v3 }
  0x94   : > { %641 = vmatpush3.bf16.msra.mxu0 %v794_v9 }
  0x95   : > { %642 = vmatprep.subr.bf16.mxu0 %v1021_v3 }
  0x98   : > { %643 = vmatpush3.bf16.msra.mxu0 %v795_v10 }
  0x9b   : > { %645 = vmatmul.mubr.bf16.vlgmr.msra.gmra.mrb[0].mxu0 %v286_v11 }
 0x16e   : > { %v395_v13 = vpop.f32.mrb[0].mxu0 }
 0x16f   : > { %v396_v14 = vadd.f32 %v604_v12, %v395_v13  ;;  %v646_v15 = vpop.f32.mrb[1].mxu0 }
 0x170   : > { %v398_v16 = vpop.f32.mrb[2].mxu0 }
 0x171   : > { %401 = vst [vmem:[%s266_s8] sm:$0xff] %v396_v14  ;;  %v647_v17 = vpop.f32.mrb[3].mxu0  ;;  %403 = vmax.xlane.f32.xlu0 %v396_v14 }
 0x1fe   : > { %v404_v20 = vpop.xlane.xlu0 %403 }
 0x1ff   : > { %v405_v21 = vmax.f32 %v402_v19, %v404_v20 }
 0x201   : > { %v407_v22 = vsub.f32 %v402_v19, %v405_v21  ;;  %424 = vst.msk [vmem:[#allocation2] sm:$0xff] %vm422_vm2, %v405_v21  ;;  %413 = vperm.xlu0 %787, %v405_v21  }
 0x203   : > { %v408_v27 = vmul.f32 1.442695, %v407_v22 }
 0x208   : > { %v429_v35 = vld [vmem:[#allocation2] sm:$0xff] (!%p613_p12) }
 0x280   : > { %v414_v23 = vpop.permute.xlu0 %413 }
 0x281   : > { %v416_v24 = vsub.f32 %v396_v14, %v414_v23 }
 0x283   : > { %v417_v25 = vmul.f32 1.442695, %v416_v24 }
 0x285   : > { %796 = vpow2.f32 %v417_v25 }
 0x286   : > { %798 = vpow2.f32 %v408_v27 }
 0x28f   : > { %v797_v26 = vpop.eup %796 }
 0x290   : > { %419 = vadd.xlane.f32.xlu1 %v797_v26  ;;  %v799_v28 = vpop.eup %798 }
 0x291   : > { %v410_v30 = vmul.f32 %v799_v28, %v406_v29 }
 0x31a   : > { %428 = sbr.rel (%p613_p12) target bundleno = 824 (0x338), region = 48 }
 0x31d   : > { %v420_v31 = vpop.xlane.xlu1 %419 }
 0x31e   : > { %v421_v32 = vadd.f32 %v420_v31, %v410_v30 }
 0x320   : > { %423 = vst.msk [vmem:[#allocation3] sm:$0xff] %vm422_vm2, %v421_v32 }
 0x327   : > { %v430_v33 = vld [vmem:[#allocation3] sm:$0xff] }
 0x328   : > { %800 = vlog2.f32 %v430_v33 }
 0x332   : > { %v801_v34 = vpop.eup %800 }
 0x333   : > { %v432_v36 = vmul.f32 0.6931472, %v801_v34 }
 0x335   : > { %v433_v37 = vadd.f32 %v432_v36, %v429_v35 }
 0x337   : > { %434 = vst.msk [vmem:[%s1318_s5] sm:$0xff] %vm422_vm2, %v433_v37 }
 0x338 PF: > { %s615_s9 = sshll.u32 %s1000_s25, 1  ;;  %s455_s13 = sshll.u32 %s266_s8, 4  ;;  %s1347_s13 = int_to_ptr.vmem [resolvable:$true] %s455_s13 }
 0x339   : > { %s451_s6 = sadd.s32 %s996_s24, %s615_s9  ;;  %s436_s5 = scalar_lea.sflag [#allocation6], %s264_s7 }
 0x33a   : > { %s616_s27 = sshll.u32 %s451_s6, 7  ;;  %s862_s29 = scalar_lea.vmem %s1347_s13, 128 }
 0x33b   : > { %s453_s21 = scalar_lea.hbm %s1425_s3, %s616_s27  ;;  %p863_p8 = scmp.ne.s32.totalorder %s1347_s13, %s862_s29 }
 0x33c   : > { %p1462_p0 = scmp.ne.s32.totalorder %s1451_s11, 0  ;;  %s1024_s24 = smov [#allocation9]  }
 0x33d   : > { %s866_s25 = sshll.u32 %s1024_s24, 4  ;;  %s867_s25 = int_to_ptr.vmem [resolvable:$false] %s866_s25 }
 0x33e   : > { %p864_p2 = pnand %p863_p8, %p1462_p0  ;;  %s868_s12 = scalar_lea.vmem %s867_s25, 256 }
 0x33f   : > { %p869_p7 = scmp.lt.s32.totalorder %s1347_s13, %s867_s25  ;;  %p870_p10 = scmp.lt.s32.totalorder %s868_s12, %s862_s29 }
 0x340   : > { %p865_p9 = pneg %p864_p2 }
 0x341   : > { %p871_p6 = por %p870_p10, %p869_p7 }
 0x343   : > { %p872_p4 = pnand %p871_p6, %p865_p9 }
 0x345   : > { %875 = shalt.err (!%p872_p4)
}
 0x346   : > { %s876_s8 = scalar_lea.hbm %s453_s21, 128  ;;  %s880_s14 = scalar_lea.hbm %s1425_s3, 512 }
 0x347   : > { %p877_p3 = scmp.ne.s32.totalorder %s453_s21, %s876_s8  ;;  %p881_p1 = scmp.lt.u32.totalorder %s453_s21, %s1425_s3 }
 0x348   : > { %p882_p5 = scmp.lt.u32.totalorder %s880_s14, %s876_s8  ;;  %p884_p8 = scmp.lt.u32.totalorder %s876_s8, %s453_s21 }
 0x349   : > { %p878_p13 = pnand %p877_p3, %p1462_p0 }
 0x34a   : > { %p883_p12 = por %p882_p5, %p881_p1 }
 0x34b   : > { %p879_p11 = pneg %p878_p13 }
 0x34c   : > { %p885_p2 = por %p884_p8, %p883_p12 }
 0x34e   : > { %p886_p9 = pnand %p885_p2, %p879_p11 }
 0x350   : > { %889 = shalt.err (!%p886_p9)
}
 0x351   : > { %652 = dma.vmem_to_hbm [thread:$0]  (%p1462_p0), %s1347_s13, 128, %s453_s21, %s436_s5  }
 0x352 PF: > { %s1463_s9 = sld [smem:[#allocation13_spill]]  ;;  %p666_p7 = scmp.ge.s32.totalorder %s1012_s28, 2 }
 0x353   : > { %p1464_p10 = scmp.ne.s32.totalorder %s1453_s10, 0 }
 0x355   : > { %p662_p6 = pnand %p666_p7, %p1464_p10 }
 0x358   : > { %s470_s6 = sand.u32 1, %s1463_s9  }
 0x359   : > { %s471_s27 = scalar_lea.sflag [#allocation6], %s470_s6 }
 0x35a   : > { %955 = dma.done.wait (!%p662_p6), %s471_s27, 128  }
 0x35b   : > { %957 = vsyncadd (!%p662_p6), %s471_s27, 4294967168  ;;  %s24_s28 = sadd.s32 1, %s1012_s28   ;;  %s1466_s11 = sld [smem:[#allocation20_spill]] }
 0x35c   : > { %p1375_p4 = scmp.ge.s32.totalorder %s24_s28, 6   ;;  %s1467_s13 = sld [smem:[#allocation18_spill]] }
 0x35d   : > { %s1468_s26 = sld [smem:[#allocation19_spill]]  ;;  %s1469_s24 = sld [smem:[#allocation14_spill]] }
 0x35e   : > { %s1470_s25 = sld [smem:[#allocation15_spill]]  ;;  %s1471_s10 = sld [smem:[#allocation16_spill]] }
 0x35f   : > { %s1472_s27 = sld [smem:[#allocation17_spill]]  ;;  %s1473_s15 = smov %s964_s16 }
 0x360   : > { %s1474_s16 = smov %s968_s17  ;;  %s1476_s18 = smov %s976_s19 }
 0x361   : > { %s1475_s17 = smov %s1466_s11  ;;  %s1477_s19 = smov %s980_s20 }
 0x362   : > { %s1478_s20 = smov %s1467_s13  ;;  %s1479_s21 = smov %s988_s22 }
 0x363   : > { %s1480_s22 = smov %s992_s23  ;;  %s1481_s23 = smov %s1468_s26 }
 0x364   : > { %s1482_s26 = smov %s1471_s10  ;;  %23 = sbr.rel (!%p1375_p4) target bundleno = 14 (0xe), region = 111 }
 0x36b   :  { %483 = vsyncpa [#allocation5], 1 }
 0x36c   :  { %485 = vsyncpa [#allocation5 + $0x1], 1 }
 0x36d   :  { %486 = vsyncpa [#allocation8], 1 }
 0x36e   :  { %488 = vsyncpa [#allocation8 + $0x1], 1 }
 0x36f   :  { %489 = vsyncpa [#allocation6], 1 }
 0x370   :  { %491 = vsyncpa [#allocation6 + $0x1], 1 }

</bundles_post_ra>
